<compile_context>
chip_gen: v6e
topology: v6e:2x2x1
jax: 0.10.0
libtpu: 0.0.40
codegen_flags: <defaults>
</compile_context>

<pallas_src>
import functools

import jax
import jax.numpy as jnp
from jax import lax
from jax.experimental import pallas as pl
from jax.experimental.pallas import tpu as pltpu

TEMPERATURE = 0.5
_NEG = -1e30  # plain Python float: finite "-inf" (exp underflows to exactly 0)


def _round_up(x, m):
    return (x + m - 1) // m * m


def _instance_loss_kernel(zi_ref, zj_ref, li_ref, lj_ref, *,
                          n, n_pad, tm, tn, temperature):
    """One grid step handles rows [i*tm, (i+1)*tm) of BOTH halves of z = [z_i; z_j].

    zi_ref / zj_ref : (n_pad, D) VMEM-resident embeddings (same block every step).
    li_ref / lj_ref : (tm, 1) per-row CE losses for the first / second half rows.
    """
    i = pl.program_id(0)
    row0 = pl.multiple_of(i * tm, tm)
    inv_t = float(1.0 / temperature)      # Python float -> weak-typed literal

    zi_t = zi_ref[pl.ds(row0, tm), :]     # (tm, D) row tile, first half
    zj_t = zj_ref[pl.ds(row0, tm), :]     # (tm, D) row tile, second half

    # positives[r] = sim[r, r+N] = sim[r+N, r] = <z_i[r], z_j[r]> / T  (D-wide dot).
    pos_half = jnp.sum(zi_t.astype(jnp.float32) * zj_t.astype(jnp.float32),
                       axis=-1, keepdims=True) * inv_t              # (tm, 1)
    pos = jnp.concatenate([pos_half, pos_half], axis=0)             # (2*tm, 1)

    # Fold 1/T into the small LHS tile; feed the MXU in the input dtype (f32/bf16).
    lhs = jnp.concatenate([zi_t, zj_t], axis=0) * inv_t             # (2*tm, D)

    # Global row indices inside the (2N, 2N) similarity matrix for this tile.
    r_loc = lax.broadcasted_iota(jnp.int32, (2 * tm, 1), 0)
    grows = row0 + r_loc + jnp.where(r_loc >= tm, n - tm, 0)        # (2*tm, 1)
    col_iota = lax.broadcasted_iota(jnp.int32, (1, tn), 1)          # (1, tn) (hoisted)

    dn = (((1,), (1,)), ((), ()))    # contract the feature dim of both operands
    num_col_tiles = n_pad // tn

    def make_body(rhs_ref, col_base):
        # Online logsumexp over (2*tm, tn) strips of one half of the columns.
        def body(c, carry):
            m, s = carry
            col0 = pl.multiple_of(c * tn, tn)
            rhs = rhs_ref[pl.ds(col0, tn), :]                        # (tn, D)
            strip = lax.dot_general(lhs, rhs, dn,
                                    preferred_element_type=jnp.float32)  # (2*tm, tn)
            lcols = col0 + col_iota
            mask = (col_base + lcols) == grows                       # sim diagonal
            if n_pad != n:                                           # static guard
                mask = jnp.logical_or(mask, lcols >= n)              # zero-padded cols
            strip = jnp.where(mask, _NEG, strip)
            m_new = jnp.maximum(m, jnp.max(strip, axis=-1, keepdims=True))
            s = s * jnp.exp(m - m_new) + jnp.sum(jnp.exp(strip - m_new),
                                                 axis=-1, keepdims=True)
            return m_new, s
        return body

    # Seed the running stats with the extra (double-counted) positive logit, exactly
    # as the PyTorch reference prepends it to the negatives.
    m0 = pos
    s0 = jnp.ones_like(pos)
    m1, s1 = lax.fori_loop(0, num_col_tiles, make_body(zi_ref, 0), (m0, s0))
    m2, s2 = lax.fori_loop(0, num_col_tiles, make_body(zj_ref, n), (m1, s1))

    loss = (m2 + jnp.log(s2)) - pos                                  # (2*tm, 1)
    li_ref[...] = loss[:tm]
    lj_ref[...] = loss[tm:]


def instance_loss(z_i, z_j, temperature=TEMPERATURE, block_rows=None, block_cols=None):
    n, d = z_i.shape
    assert z_j.shape == (n, d)

    # Row tile.
    if block_rows is None:
        block_rows = min(128, _round_up(n, 8))
    tm = max(8, _round_up(int(block_rows), 8))
    n_pad = _round_up(n, tm)
    if n_pad != n:
        pad = ((0, n_pad - n), (0, 0))
        z_i = jnp.pad(z_i, pad)
        z_j = jnp.pad(z_j, pad)

    # Column tile (online-logsumexp chunk); must divide n_pad.
    if block_cols is None:
        tn = n_pad
        for cand in (512, 256, 128):
            if n_pad % cand == 0:
                tn = cand
                break
    else:
        tn = int(block_cols)
        assert n_pad % tn == 0, (n_pad, tn)

    num_tiles = n_pad // tm
    itemsize = jnp.dtype(z_i.dtype).itemsize
    resident = 2 * 2 * n_pad * d * itemsize        # two resident inputs, double-buffered
    strips = 8 * (2 * tm) * tn * 4                 # live f32 strip + exp temporaries
    needed = resident + strips + (2 << 20)
    try:
        cap = int(pltpu.get_tpu_info().vmem_capacity_bytes)
    except Exception:
        cap = 64 << 20                             # v7x per-core VMEM (most restrictive)
    vmem_limit = int(min(int(0.85 * cap), max(32 << 20, needed)))

    kernel = functools.partial(
        _instance_loss_kernel,
        n=n, n_pad=n_pad, tm=tm, tn=tn, temperature=float(temperature))

    loss_i, loss_j = pl.pallas_call(
        kernel,
        grid=(num_tiles,),
        in_specs=[
            pl.BlockSpec((n_pad, d), lambda i: (0, 0)),   # z_i: VMEM-resident
            pl.BlockSpec((n_pad, d), lambda i: (0, 0)),   # z_j: VMEM-resident
        ],
        out_specs=[
            pl.BlockSpec((tm, 1), lambda i: (i, 0)),      # per-row loss, first half
            pl.BlockSpec((tm, 1), lambda i: (i, 0)),      # per-row loss, second half
        ],
        out_shape=[
            jax.ShapeDtypeStruct((n_pad, 1), jnp.float32),
            jax.ShapeDtypeStruct((n_pad, 1), jnp.float32),
        ],
        compiler_params=pltpu.CompilerParams(
            dimension_semantics=("parallel",),
            vmem_limit_bytes=vmem_limit),
    )(z_i, z_j)

    # CrossEntropyLoss(reduction='sum'); .mean() of a scalar is the scalar.
    return jnp.sum(loss_i[:n, 0]) + jnp.sum(loss_j[:n, 0])


def _reference_loss(z_i, z_j, temperature=TEMPERATURE):
    """Plain-JAX transcription of the PyTorch forward, for verification."""
    n = z_i.shape[0]
    z = jnp.concatenate([z_i, z_j], axis=0).astype(jnp.float32)
    sim = (z @ z.T) / temperature
    idx = jnp.arange(2 * n)
    sim = sim.at[idx, idx].set(-jnp.inf)
    pos = jnp.concatenate([jnp.diagonal(sim[:n, n:]), jnp.diagonal(sim[n:, :n])])
    # logits row r = [pos_r, all non-diagonal entries of row r]; the diagonal is -inf
    # so logsumexp over [pos_r, entire row r] equals logsumexp over the logits.
    lse = jax.nn.logsumexp(jnp.concatenate([pos[:, None], sim], axis=1), axis=1)
    # CE(reduction='sum') on log_softmax(logits) with zero labels; .mean() of scalar.
    return jnp.sum(lse - pos)


if __name__ == "__main__":
    key = jax.random.PRNGKey(0)
    k1, k2 = jax.random.split(key)
    N, D = 16, 32
    z_i = jax.random.normal(k1, (N, D), dtype=jnp.float32)
    z_j = jax.random.normal(k2, (N, D), dtype=jnp.float32)

    # f32 run with small tiles so both the multi-row-tile ("parallel") path and the
    # multi-column-tile online-logsumexp loop are exercised.
    loss = instance_loss(z_i, z_j, block_rows=8, block_cols=8)
    loss = jax.block_until_ready(loss)
    ref = _reference_loss(z_i, z_j)
    assert jnp.allclose(loss, ref, rtol=1e-4, atol=1e-3), (loss, ref)

    # bf16 MXU inputs (f32 accumulation), default tiling — looser tolerance.
    loss_bf16 = instance_loss(z_i.astype(jnp.bfloat16), z_j.astype(jnp.bfloat16))
    loss_bf16 = jax.block_until_ready(loss_bf16)
    assert jnp.isfinite(loss_bf16)
    assert jnp.allclose(loss_bf16, ref, rtol=1e-1, atol=1.0), (loss_bf16, ref)

    print("KERNEL_OK")
</pallas_src>

<mosaic_0001>
module attributes {stable_mosaic.version = 11 : i64} {
  func.func @_instance_loss_kernel(%arg0: i32, %arg1: memref<16x32xf32, #tpu.memory_space<vmem>>, %arg2: memref<16x32xf32, #tpu.memory_space<vmem>>, %arg3: memref<8x1xf32, #tpu.memory_space<vmem>>, %arg4: memref<8x1xf32, #tpu.memory_space<vmem>>) attributes {dimension_semantics = [#tpu.dimension_semantics<parallel>], iteration_bounds = array<i64: 2>, scalar_prefetch = 0 : i64, scratch_operands = 0 : i64, tpu.core_type = #tpu.core_type<tc>, window_params = [{pipeline_mode = #tpu.pipeline_mode<synchronous>, transform_indices = @transform_0, window_bounds = array<i64: 16, 32>}, {pipeline_mode = #tpu.pipeline_mode<synchronous>, transform_indices = @transform_1, window_bounds = array<i64: 16, 32>}, {transform_indices = @transform_2, window_bounds = array<i64: 8, 1>}, {transform_indices = @transform_3, window_bounds = array<i64: 8, 1>}]} {
    %c8_i32 = arith.constant 8 : i32
    %0 = arith.muli %arg0, %c8_i32 : i32
    %1 = tpu.assume_multiple %0, 8 : i32
    %2 = arith.index_cast %1 : i32 to index
    %c0 = arith.constant 0 : index
    %3 = vector.load %arg1[%2, %c0] : memref<16x32xf32, #tpu.memory_space<vmem>>, vector<8x32xf32>
    %4 = arith.index_cast %1 : i32 to index
    %c0_0 = arith.constant 0 : index
    %5 = vector.load %arg2[%4, %c0_0] : memref<16x32xf32, #tpu.memory_space<vmem>>, vector<8x32xf32>
    %6 = arith.mulf %3, %5 : vector<8x32xf32>
    %cst = arith.constant dense<0.000000e+00> : vector<8xf32>
    %7 = vector.multi_reduction <add>, %6, %cst [1] : vector<8x32xf32> to vector<8xf32>
    %8 = vector.shape_cast %7 : vector<8xf32> to vector<8x1xf32>
    %cst_1 = arith.constant 2.000000e+00 : f32
    %9 = vector.broadcast %cst_1 : f32 to vector<8x1xf32>
    %10 = arith.mulf %8, %9 : vector<8x1xf32>
    %11 = tpu.concatenate %10, %10 in 0 : vector<8x1xf32>, vector<8x1xf32> -> vector<16x1xf32>
    %12 = tpu.concatenate %3, %5 in 0 : vector<8x32xf32>, vector<8x32xf32> -> vector<16x32xf32>
    %cst_2 = arith.constant 2.000000e+00 : f32
    %13 = vector.broadcast %cst_2 : f32 to vector<16x32xf32>
    %14 = arith.mulf %12, %13 : vector<16x32xf32>
    %15 = tpu.iota {dimensions = array<i32: 0>} : vector<16x1xi32>
    %16 = vector.broadcast %1 : i32 to vector<16x1xi32>
    %17 = arith.addi %16, %15 : vector<16x1xi32>
    %c8_i32_3 = arith.constant 8 : i32
    %18 = vector.broadcast %c8_i32_3 : i32 to vector<16x1xi32>
    %19 = arith.cmpi sge, %15, %18 : vector<16x1xi32>
    %c8_i32_4 = arith.constant 8 : i32
    %c0_i32 = arith.constant 0 : i32
    %20 = vector.broadcast %c8_i32_4 : i32 to vector<16x1xi32>
    %21 = vector.broadcast %c0_i32 : i32 to vector<16x1xi32>
    %22 = arith.select %19, %20, %21 : vector<16x1xi1>, vector<16x1xi32>
    %23 = arith.addi %17, %22 : vector<16x1xi32>
    %24 = tpu.iota {dimensions = array<i32: 1>} : vector<1x8xi32>
    %cst_5 = arith.constant 1.000000e+00 : f32
    %25 = vector.broadcast %cst_5 : f32 to vector<16x1xf32>
    %c0_i32_6 = arith.constant 0 : i32
    %c2_i32 = arith.constant 2 : i32
    %26 = arith.addi %c0_i32_6, %c2_i32 : i32
    %c1_i32 = arith.constant 1 : i32
    %27:2 = scf.for %arg5 = %c0_i32_6 to %26 step %c1_i32 iter_args(%arg6 = %11, %arg7 = %25) -> (vector<16x1xf32>, vector<16x1xf32>)  : i32 {
      %c8_i32_16 = arith.constant 8 : i32
      %37 = arith.muli %arg5, %c8_i32_16 : i32
      %38 = tpu.assume_multiple %37, 8 : i32
      %39 = arith.index_cast %38 : i32 to index
      %c0_17 = arith.constant 0 : index
      %40 = vector.load %arg1[%39, %c0_17] : memref<16x32xf32, #tpu.memory_space<vmem>>, vector<8x32xf32>
      %cst_18 = arith.constant dense<0.000000e+00> : vector<16x8xf32>
      %41 = tpu.matmul %14, %40, %cst_18 {dimension_numbers = #tpu.dot_dimension_numbers<[1], [1], [0], [0], [0, 0, 1, 0], [], []>} : vector<16x32xf32>, vector<8x32xf32>, vector<16x8xf32> -> vector<16x8xf32>
      %42 = vector.broadcast %38 : i32 to vector<1x8xi32>
      %43 = arith.addi %42, %24 : vector<1x8xi32>
      %c0_i32_19 = arith.constant 0 : i32
      %44 = vector.broadcast %c0_i32_19 : i32 to vector<1x8xi32>
      %45 = arith.addi %44, %43 : vector<1x8xi32>
      %46 = vector.broadcast %45 : vector<1x8xi32> to vector<16x8xi32>
      %47 = vector.broadcast %23 : vector<16x1xi32> to vector<16x8xi32>
      %48 = arith.cmpi eq, %46, %47 : vector<16x8xi32>
      %cst_20 = arith.constant -1.000000e+30 : f32
      %49 = vector.broadcast %cst_20 : f32 to vector<16x8xf32>
      %50 = arith.select %48, %49, %41 : vector<16x8xi1>, vector<16x8xf32>
      %cst_21 = arith.constant dense<0xFF800000> : vector<16xf32>
      %51 = vector.multi_reduction <maximumf>, %50, %cst_21 [1] : vector<16x8xf32> to vector<16xf32>
      %52 = vector.shape_cast %51 : vector<16xf32> to vector<16x1xf32>
      %53 = arith.maximumf %arg6, %52 : vector<16x1xf32>
      %54 = arith.subf %arg6, %53 : vector<16x1xf32>
      %55 = math.exp %54 : vector<16x1xf32>
      %56 = arith.mulf %arg7, %55 : vector<16x1xf32>
      %57 = vector.broadcast %53 : vector<16x1xf32> to vector<16x8xf32>
      %58 = arith.subf %50, %57 : vector<16x8xf32>
      %59 = math.exp %58 : vector<16x8xf32>
      %cst_22 = arith.constant dense<0.000000e+00> : vector<16xf32>
      %60 = vector.multi_reduction <add>, %59, %cst_22 [1] : vector<16x8xf32> to vector<16xf32>
      %61 = vector.shape_cast %60 : vector<16xf32> to vector<16x1xf32>
      %62 = arith.addf %56, %61 : vector<16x1xf32>
      scf.yield %53, %62 : vector<16x1xf32>, vector<16x1xf32>
    }
    %c2_i32_7 = arith.constant 2 : i32
    %c0_i32_8 = arith.constant 0 : i32
    %c2_i32_9 = arith.constant 2 : i32
    %28 = arith.addi %c0_i32_8, %c2_i32_9 : i32
    %c1_i32_10 = arith.constant 1 : i32
    %29:2 = scf.for %arg5 = %c0_i32_8 to %28 step %c1_i32_10 iter_args(%arg6 = %27#0, %arg7 = %27#1) -> (vector<16x1xf32>, vector<16x1xf32>)  : i32 {
      %c8_i32_16 = arith.constant 8 : i32
      %37 = arith.muli %arg5, %c8_i32_16 : i32
      %38 = tpu.assume_multiple %37, 8 : i32
      %39 = arith.index_cast %38 : i32 to index
      %c0_17 = arith.constant 0 : index
      %40 = vector.load %arg2[%39, %c0_17] : memref<16x32xf32, #tpu.memory_space<vmem>>, vector<8x32xf32>
      %cst_18 = arith.constant dense<0.000000e+00> : vector<16x8xf32>
      %41 = tpu.matmul %14, %40, %cst_18 {dimension_numbers = #tpu.dot_dimension_numbers<[1], [1], [0], [0], [0, 0, 1, 0], [], []>} : vector<16x32xf32>, vector<8x32xf32>, vector<16x8xf32> -> vector<16x8xf32>
      %42 = vector.broadcast %38 : i32 to vector<1x8xi32>
      %43 = arith.addi %42, %24 : vector<1x8xi32>
      %c16_i32 = arith.constant 16 : i32
      %44 = vector.broadcast %c16_i32 : i32 to vector<1x8xi32>
      %45 = arith.addi %44, %43 : vector<1x8xi32>
      %46 = vector.broadcast %45 : vector<1x8xi32> to vector<16x8xi32>
      %47 = vector.broadcast %23 : vector<16x1xi32> to vector<16x8xi32>
      %48 = arith.cmpi eq, %46, %47 : vector<16x8xi32>
      %cst_19 = arith.constant -1.000000e+30 : f32
      %49 = vector.broadcast %cst_19 : f32 to vector<16x8xf32>
      %50 = arith.select %48, %49, %41 : vector<16x8xi1>, vector<16x8xf32>
      %cst_20 = arith.constant dense<0xFF800000> : vector<16xf32>
      %51 = vector.multi_reduction <maximumf>, %50, %cst_20 [1] : vector<16x8xf32> to vector<16xf32>
      %52 = vector.shape_cast %51 : vector<16xf32> to vector<16x1xf32>
      %53 = arith.maximumf %arg6, %52 : vector<16x1xf32>
      %54 = arith.subf %arg6, %53 : vector<16x1xf32>
      %55 = math.exp %54 : vector<16x1xf32>
      %56 = arith.mulf %arg7, %55 : vector<16x1xf32>
      %57 = vector.broadcast %53 : vector<16x1xf32> to vector<16x8xf32>
      %58 = arith.subf %50, %57 : vector<16x8xf32>
      %59 = math.exp %58 : vector<16x8xf32>
      %cst_21 = arith.constant dense<0.000000e+00> : vector<16xf32>
      %60 = vector.multi_reduction <add>, %59, %cst_21 [1] : vector<16x8xf32> to vector<16xf32>
      %61 = vector.shape_cast %60 : vector<16xf32> to vector<16x1xf32>
      %62 = arith.addf %56, %61 : vector<16x1xf32>
      scf.yield %53, %62 : vector<16x1xf32>, vector<16x1xf32>
    }
    %c2_i32_11 = arith.constant 2 : i32
    %30 = math.log %29#1 : vector<16x1xf32>
    %31 = arith.addf %29#0, %30 : vector<16x1xf32>
    %32 = arith.subf %31, %11 : vector<16x1xf32>
    %33 = vector.extract_strided_slice %32 {offsets = [0, 0], sizes = [8, 1], strides = [1, 1]} : vector<16x1xf32> to vector<8x1xf32>
    %c0_12 = arith.constant 0 : index
    %c0_13 = arith.constant 0 : index
    %34 = vector.load %arg3[%c0_12, %c0_13] : memref<8x1xf32, #tpu.memory_space<vmem>>, vector<8x1xf32>
    tpu.vector_store %arg3[%c0_12, %c0_13], %33 {strides = array<i32>} : memref<8x1xf32, #tpu.memory_space<vmem>>, vector<8x1xf32>,
    %35 = vector.extract_strided_slice %32 {offsets = [8, 0], sizes = [8, 1], strides = [1, 1]} : vector<16x1xf32> to vector<8x1xf32>
    %c0_14 = arith.constant 0 : index
    %c0_15 = arith.constant 0 : index
    %36 = vector.load %arg4[%c0_14, %c0_15] : memref<8x1xf32, #tpu.memory_space<vmem>>, vector<8x1xf32>
    tpu.vector_store %arg4[%c0_14, %c0_15], %35 {strides = array<i32>} : memref<8x1xf32, #tpu.memory_space<vmem>>, vector<8x1xf32>,
    return
  }
  func.func @transform_0(%arg0: i32) -> (i32, i32) {
    %c0_i32 = arith.constant 0 : i32
    %c0_i32_0 = arith.constant 0 : i32
    %c0_i32_1 = arith.constant 0 : i32
    return %c0_i32, %c0_i32_0 : i32, i32
  }
  func.func @transform_1(%arg0: i32) -> (i32, i32) {
    %c0_i32 = arith.constant 0 : i32
    %c0_i32_0 = arith.constant 0 : i32
    %c0_i32_1 = arith.constant 0 : i32
    return %c0_i32, %c0_i32_0 : i32, i32
  }
  func.func @transform_2(%arg0: i32) -> (i32, i32) {
    %c0_i32 = arith.constant 0 : i32
    %c0_i32_0 = arith.constant 0 : i32
    return %arg0, %c0_i32 : i32, i32
  }
  func.func @transform_3(%arg0: i32) -> (i32, i32) {
    %c0_i32 = arith.constant 0 : i32
    %c0_i32_0 = arith.constant 0 : i32
    return %arg0, %c0_i32 : i32, i32
  }
}

</mosaic_0001>

<bundles_post_ra>
// kernel: tpu_custom_call.1
= control target key start
LH: loop header
LB: loop body
LE: loop exit
PB: predicated region body
PF: predicated region fallthrough
CT: control target
= control target key end

     0   :  { %9 = vsyncpa [#allocation3], 0  ;;  %s1171_s0 = inlined_call_operand.hbm [shape: f32[16,32], index: 0, kind: input, shape index: {}]   ;;  %s1172_s1 = inlined_call_operand.hbm [shape: f32[16,32], index: 1, kind: input, shape index: {}]   ;;  %s1173_s2 = inlined_call_operand.vmem [shape: f32[16,1], index: 2, kind: output, shape index: {0}]   ;;  %s1174_s3 = inlined_call_operand.vmem [shape: f32[16,1], index: 3, kind: output, shape index: {1}]  }
   0x1   :  { %10 = vsyncpa [#allocation5], 0  ;;  %s1001_s12 = smov 0  }
   0x2 LB: > { %s1007_s13 = sadd.s32 4294967295, %s933_s12   ;;  %p655_p0 = scmp.ge.s32.totalorder %s933_s12, 1  ;;  %s933_s12 = sphi %s1001_s12, %s16_s12  }
   0x3   : > { %p115_p1 = scmp.lt.s32.totalorder %s933_s12, 3  ;;  %s975_s14 = smov [#allocation2]  }
   0x4   : > { %s127_s15 = sshll.u32 %s975_s14, 4  ;;  %p705_p3 = scmp.eq.s32.totalorder %s1007_s13, 0  ;;  %s128_s15 = int_to_ptr.vmem [resolvable:$true] %s127_s15 }
   0x5   : > { %p1011_p2 = pnand %p655_p0, %p115_p1  ;;  %s976_s17 = smov [#allocation4]  }
   0x6   : > { %s140_s18 = sshll.u32 %s976_s17, 4  ;;  %s838_s20 = scalar_lea.vmem %s128_s15, 256  ;;  %s141_s18 = int_to_ptr.vmem [resolvable:$true] %s140_s18 }
   0x7   : > { %p698_p4 = pneg %p1011_p2  ;;  %p839_p7 = scmp.ne.s32.totalorder %s128_s15, %s838_s20 }
   0x8   : > { %p846_p10 = scmp.lt.s32.totalorder %s128_s15, %s128_s15  ;;  %p847_p11 = scmp.lt.s32.totalorder %s838_s20, %s838_s20 }
   0x9   : > { %p1020_p5 = pnand %p705_p3, %p698_p4 }
   0xa   : > { %p848_p12 = por %p847_p11, %p846_p10 }
   0xb   : > { %p829_p6 = pneg %p1020_p5 }
   0xd   : > { %p841_p8 = pnand %p839_p7, %p829_p6 }
   0xf   : > { %p842_p9 = pneg %p841_p8 }
  0x11   : > { %p849_p13 = pnand %p848_p12, %p842_p9 }
  0x13   : > { %852 = shalt.err (!%p849_p13)
}
  0x14   : > { %s977_s21 = smov 128   ;;  %s978_s22 = smov 8  }
  0x15   : > { %701 = dma.hbm_to_vmem [thread:$0]  (!%p1020_p5), %s1171_s0, 256, %s128_s15, [#allocation3], %s977_s21, %s977_s21, %s978_s22  }
  0x16   : > { %s864_s25 = scalar_lea.vmem %s141_s18, 256  ;;  %p872_p7 = scmp.lt.s32.totalorder %s141_s18, %s141_s18 }
  0x17   : > { %p865_p0 = scmp.ne.s32.totalorder %s141_s18, %s864_s25  ;;  %p873_p8 = scmp.lt.s32.totalorder %s864_s25, %s864_s25 }
  0x19   : > { %p867_p1 = pnand %p865_p0, %p829_p6  ;;  %p874_p10 = por %p873_p8, %p872_p7 }
  0x1b   : > { %p868_p4 = pneg %p867_p1 }
  0x1d   : > { %p875_p9 = pnand %p874_p10, %p868_p4 }
  0x1f   : > { %878 = shalt.err (!%p875_p9)
}
  0x20   : > { %704 = dma.hbm_to_vmem [thread:$0]  (!%p1020_p5), %s1172_s1, 256, %s141_s18, [#allocation5], %s977_s21, %s977_s21, %s978_s22  }
  0x21   : > { %156 = sbr.rel (%p1011_p2) target bundleno = 1473 (0x5c1), region = 28 }
  0x26   : > { %924 = dma.done.wait (%p705_p3), [#allocation3], 256  }
  0x27   : > { %926 = vsyncadd (%p705_p3), [#allocation3], 4294967040 }
  0x28   : > { %928 = dma.done.wait (%p705_p3), [#allocation5], 256  }
  0x29   : > { %930 = vsyncadd (%p705_p3), [#allocation5], 4294967040  ;;  %p182_p6 = scmp.lt.s32.totalorder %s1007_s13, 1  ;;  %s663_s28 = sshll.u32 %s1007_s13, 3  ;;  %v203_v0 = vlaneseq  ;;  %vm196_vm0 = vcmask 261120   ;;  %v1078_v16 = vmov 1.0  }
  0x2a   : > { %v206_v3 = vstv %s663_s28  ;;  %s191_s9 = scalar_lea.vmem [#allocation2], %s663_s28  ;;  %s193_s10 = scalar_lea.vmem [#allocation4], %s663_s28  ;;  %v1080_v17 = vmov 1.0  }
  0x2b   : > { %s1188_s13 = smov (!%p182_p6, %s1007_s13), 1  ;;  %v204_v1 = vshrl.u32 %v203_v0, 7  ;;  %v1055_v2 = vand.u32 127, %v203_v0  ;;  %v192_v7 = vld [vmem:[%s191_s9] sm:$0xff]  ;;  %s1088_s11 = smov 0  }
  0x2c   : > { %s661_s29 = sshll.u32 %s1188_s13, 3  ;;  %v194_v8 = vld [vmem:[%s193_s10] sm:$0xff]  ;;  %v1069_v10 = vmul.f32 2.0, %v192_v7 }
  0x2d   : > { %v205_v4 = vadd.s32 8, %v204_v1  ;;  %v1057_v5 = vadd.s32 %v206_v3, %v204_v1  ;;  %s1062_s5 = scalar_lea.vmem %s1173_s2, %s661_s29  ;;  %s1067_s8 = scalar_lea.vmem %s1174_s3, %s661_s29  ;;  %v195_v9 = vmul.f32 %v194_v8, %v192_v7  ;;  %v1071_v11 = vmul.f32 2.0, %v194_v8 }
  0x2f   : > { %v208_v6 = vadd.s32 %v206_v3, %v205_v4  ;;  %v197_v13 = vsel %vm196_vm0, %v195_v9, 0.0 }
  0x30   : > { %198 = vadd.xlane.f32.xlu0 %v197_v13 }
  0x31   : > { %v1073_v12 = vadd.s32 8, %v208_v6 }
  0xb9   : > { %v199_v14 = vpop.xlane.xlu0 %198 }
  0xba   : > { %v1076_v15 = vmul.f32 2.0, %v199_v14  }
  0xbc   : > { %v1177_v18 = vmov %v1076_v15  ;;  %v1178_v19 = vmov %v1076_v15 }
  0xbd LB: >> { %682 = vmatprep.mubr.msk.f32.mxu0 %vm196_vm0, %v1069_v10  ;;  %s664_s13 = sshll.u32 %s953_s11, 3  ;;  %vm320_vm3 = vcmask 64512   ;;  %v979_v29 = vmov 0   ;;  %s222_s11 = sadd.s32 1, %s953_s11   ;;  %s953_s11 = sphi %s1088_s11, %s222_s11   ;;  %v949_v19 = vphi %v1178_v19, %v1182_v19   ;;  %v945_v18 = vphi %v1177_v18, %v1181_v18   ;;  %v941_v17 = vphi %v1080_v17, %v1180_v17   ;;  %v937_v16 = vphi %v1078_v16, %v1179_v16  }
  0xbe   : >> { %s228_s14 = scalar_lea.vmem [#allocation2], %s664_s13  ;;  %v314_v21 = vstv %s664_s13  ;;  %803 = vset.pattern.permute.xlu1 %v979_v29  ;;  %804 = vset.pattern.permute.xlu0 %v979_v29  ;;  %p219_p2 = scmp.ge.s32.totalorder %s222_s11, 2  }
  0xbf   : >> { %v229_v20 = vld [vmem:[%s228_s14] sm:$0xff]  ;;  %v315_v22 = vadd.s32 %v314_v21, %v1055_v2  ;;  %s1130_s15 = smov (%p219_p2), 0  }
  0xc0   : >> { %680 = vmatprep.subr.msk.mxu0 %vm196_vm0, %v229_v20 }
  0xc1   : >> { %681 = vmatpush3.xpose.msk.msra.mxu0 %vm196_vm0, %v229_v20  ;;  %vm316_vm1 = vcmp.eq.s32.totalorder %v315_v22, %v1057_v5  ;;  %vm317_vm2 = vcmp.eq.s32.totalorder %v315_v22, %v1073_v12 }
  0xc4   : >> { %683 = vmatmul.mubr.msk.f32.vlgmr.msra.gmra.mxu0 %vm196_vm0, %v1071_v11 }
 0x184   : >> { %v684_v23 = vpop.f32.mrf.mxu0 }
 0x185   : >> { %v319_v27 = vsel %vm317_vm2, -1e+30, %v684_v23 }
 0x186   : >> { %v305_v24 = vpop.f32.mrf.mxu0  ;;  %v324_v28 = vsel %vm320_vm3, %v319_v27, -inf }
 0x187   : >> { %v318_v25 = vsel %vm316_vm1, -1e+30, %v305_v24 }
 0x188   : >> { %v321_v26 = vsel %vm320_vm3, %v318_v25, -inf }
 0x189   : >> { %322 = vmax.xlane.f32.xlu0 %v321_v26 }
 0x18d   : >> { %325 = vmax.xlane.f32.xlu0 %v324_v28 }
 0x212   : >> { %v323_v30 = vpop.xlane.xlu0 %322 }
 0x213   : >> { %v327_v31 = vmax.f32 %v949_v19, %v323_v30  }
 0x215   : >> { %v329_v32 = vsub.f32 %v949_v19, %v327_v31  ;;  %339 = vperm.xlu1 %803, %v327_v31   ;;  %v1182_v19 = vmov %v327_v31 }
 0x216   : >> { %v326_v33 = vpop.xlane.xlu0 %325 }
 0x217   : >> { %v328_v34 = vmax.f32 %v945_v18, %v326_v33   ;;  %v331_v46 = vmul.f32 1.442695, %v329_v32 }
 0x219   : >> { %v330_v35 = vsub.f32 %v945_v18, %v328_v34  ;;  %344 = vperm.xlu1 %803, %v328_v34   ;;  %v1181_v18 = vmov %v328_v34 }
 0x21b   : >> { %v333_v47 = vmul.f32 1.442695, %v330_v35 }
 0x290   : >> { %v340_v36 = vpop.permute.xlu1 %339 }
 0x291   : >> { %v347_v37 = vsub.f32 %v318_v25, %v340_v36 }
 0x293   : >> { %v349_v38 = vmul.f32 1.442695, %v347_v37 }
 0x294   : >> { %v345_v39 = vpop.permute.xlu1 %344 }
 0x295   : >> { %805 = vpow2.f32 %v349_v38  ;;  %v348_v40 = vsub.f32 %v319_v27, %v345_v39 }
 0x297   : >> { %v351_v41 = vmul.f32 1.442695, %v348_v40 }
 0x299   : >> { %807 = vpow2.f32 %v351_v41 }
 0x29a   : >> { %809 = vpow2.f32 %v331_v46 }
 0x29b   : >> { %811 = vpow2.f32 %v333_v47 }
 0x2a2   : >> { %v806_v42 = vpop.eup %805 }
 0x2a3   : >> { %v353_v43 = vsel %vm320_vm3, %v806_v42, 0.0 }
 0x2a4   : >> { %354 = vadd.xlane.f32.xlu0 %v353_v43 }
 0x2a6   : >> { %v808_v44 = vpop.eup %807 }
 0x2a7   : >> { %v356_v45 = vsel %vm320_vm3, %v808_v44, 0.0  ;;  %v810_v48 = vpop.eup %809 }
 0x2a8   : >> { %357 = vadd.xlane.f32.xlu1 %v356_v45  ;;  %v335_v49 = vmul.f32 %v941_v17, %v810_v48  ;;  %v812_v50 = vpop.eup %811 }
 0x2a9   : >> { %v336_v53 = vmul.f32 %v937_v16, %v812_v50 }
 0x32d   : >> { %v355_v51 = vpop.xlane.xlu0 %354 }
 0x32e   : >> { %v359_v52 = vadd.f32 %v355_v51, %v335_v49  }
 0x330   : >> { %v1180_v17 = vmov %v359_v52  ;;  %221 = sbr.rel (!%p219_p2) target bundleno = 189 (0xbd), region = 94 }
 0x331   : >> { %v358_v54 = vpop.xlane.xlu1 %357 }
 0x332   : >> { %v360_v55 = vadd.f32 %v358_v54, %v336_v53  }
 0x334   : >> { %v1179_v16 = vmov %v360_v55 }
 0x335 LB: >> { %687 = vmatprep.mubr.msk.f32.mxu0 %vm196_vm0, %v1069_v10  ;;  %s668_s16 = sshll.u32 %s973_s15, 3  ;;  %v980_v3 = vmov 0   ;;  %s366_s15 = sadd.s32 1, %s973_s15   ;;  %s973_s15 = sphi %s1130_s15, %s366_s15   ;;  %v969_v31 = vphi %v327_v31, %v1186_v31   ;;  %v965_v34 = vphi %v328_v34, %v1185_v34   ;;  %v961_v52 = vphi %v359_v52, %v1184_v52   ;;  %v957_v55 = vphi %v360_v55, %v1183_v55  }
 0x336   : >> { %s372_s17 = scalar_lea.vmem [#allocation4], %s668_s16  ;;  %v458_v57 = vstv %s668_s16  ;;  %813 = vset.pattern.permute.xlu1 %v980_v3  ;;  %814 = vset.pattern.permute.xlu0 %v980_v3  ;;  %p363_p3 = scmp.ge.s32.totalorder %s366_s15, 2  }
 0x337   : >> { %v373_v56 = vld [vmem:[%s372_s17] sm:$0xff]  ;;  %v459_v58 = vadd.s32 %v458_v57, %v1055_v2  ;;  %vm514_vm6 = vcmask (%p363_p3), 7168  }
 0x338   : >> { %685 = vmatprep.subr.msk.mxu0 %vm196_vm0, %v373_v56 }
 0x339   : >> { %686 = vmatpush3.xpose.msk.msra.mxu0 %vm196_vm0, %v373_v56  ;;  %v460_v59 = vadd.s32 16, %v459_v58 }
 0x33b   : >> { %vm461_vm4 = vcmp.eq.s32.totalorder %v460_v59, %v1057_v5  ;;  %vm462_vm5 = vcmp.eq.s32.totalorder %v460_v59, %v1073_v12 }
 0x33c   : >> { %688 = vmatmul.mubr.msk.f32.vlgmr.msra.gmra.mxu0 %vm196_vm0, %v1071_v11 }
 0x3fc   : >> { %v689_v60 = vpop.f32.mrf.mxu0 }
 0x3fd   : >> { %v464_v0 = vsel %vm462_vm5, -1e+30, %v689_v60 }
 0x3fe   : >> { %v449_v61 = vpop.f32.mrf.mxu0  ;;  %v469_v1 = vsel %vm320_vm3, %v464_v0, -inf }
 0x3ff   : >> { %v463_v62 = vsel %vm461_vm4, -1e+30, %v449_v61 }
 0x400   : >> { %v466_v63 = vsel %vm320_vm3, %v463_v62, -inf }
 0x401   : >> { %467 = vmax.xlane.f32.xlu0 %v466_v63 }
 0x405   : >> { %470 = vmax.xlane.f32.xlu0 %v469_v1 }
 0x48a   : >> { %v468_v4 = vpop.xlane.xlu0 %467 }
 0x48b   : >> { %v472_v6 = vmax.f32 %v969_v31, %v468_v4  }
 0x48d   : >> { %v474_v7 = vsub.f32 %v969_v31, %v472_v6  ;;  %484 = vperm.xlu1 %813, %v472_v6  }
 0x48e   : >> { %v471_v8 = vpop.xlane.xlu0 %470 }
 0x48f   : >> { %v473_v9 = vmax.f32 %v965_v34, %v471_v8   ;;  %v476_v25 = vmul.f32 1.442695, %v474_v7 }
 0x491   : >> { %v475_v13 = vsub.f32 %v965_v34, %v473_v9  ;;  %489 = vperm.xlu1 %813, %v473_v9   ;;  %v1185_v34 = vmov %v473_v9 }
 0x493   : >> { %v478_v26 = vmul.f32 1.442695, %v475_v13 }
 0x508   : >> { %v485_v14 = vpop.permute.xlu1 %484 }
 0x509   : >> { %v492_v16 = vsub.f32 %v463_v62, %v485_v14 }
 0x50b   : >> { %v494_v17 = vmul.f32 1.442695, %v492_v16 }
 0x50c   : >> { %v490_v18 = vpop.permute.xlu1 %489 }
 0x50d   : >> { %815 = vpow2.f32 %v494_v17  ;;  %v493_v19 = vsub.f32 %v464_v0, %v490_v18 }
 0x50f   : >> { %v496_v20 = vmul.f32 1.442695, %v493_v19 }
 0x511   : >> { %817 = vpow2.f32 %v496_v20 }
 0x512   : >> { %819 = vpow2.f32 %v476_v25 }
 0x513   : >> { %821 = vpow2.f32 %v478_v26 }
 0x51a   : >> { %v816_v21 = vpop.eup %815 }
 0x51b   : >> { %v498_v22 = vsel %vm320_vm3, %v816_v21, 0.0 }
 0x51c   : >> { %499 = vadd.xlane.f32.xlu0 %v498_v22 }
 0x51e   : >> { %v818_v23 = vpop.eup %817 }
 0x51f   : >> { %v501_v24 = vsel %vm320_vm3, %v818_v23, 0.0  ;;  %v820_v27 = vpop.eup %819 }
 0x520   : >> { %502 = vadd.xlane.f32.xlu1 %v501_v24  ;;  %v480_v28 = vmul.f32 %v961_v52, %v820_v27  ;;  %v822_v29 = vpop.eup %821 }
 0x521   : >> { %v481_v31 = vmul.f32 %v957_v55, %v822_v29 }
 0x5a5   : >> { %v500_v30 = vpop.xlane.xlu0 %499 }
 0x5a6   : >> { %v504_v32 = vadd.f32 %v500_v30, %v480_v28  }
 0x5a8   : >> { %v1184_v52 = vmov %v504_v32  ;;  %365 = sbr.rel (!%p363_p3) target bundleno = 821 (0x335), region = 105  ;;  %823 = vlog2.f32 (%p363_p3), %v504_v32 }
 0x5a9   : >> { %v503_v33 = vpop.xlane.xlu1 %502 }
 0x5aa   : >> { %v505_v35 = vadd.f32 %v503_v33, %v481_v31   ;;  %v1186_v31 = vmov %v472_v6 }
 0x5ac   : >> { %v1183_v55 = vmov %v505_v35  ;;  %825 = vlog2.f32 (%p363_p3), %v505_v35 }
 0x5b5   : > { %v824_v36 = vpop.eup %823 }
 0x5b6   : > { %v507_v38 = vmul.f32 0.6931472, %v824_v36 }
 0x5b8   : > { %v510_v40 = vadd.f32 %v507_v38, %v472_v6 }
 0x5b9   : > { %v826_v37 = vpop.eup %825 }
 0x5ba   : > { %v509_v39 = vmul.f32 0.6931472, %v826_v37  ;;  %v512_v42 = vsub.f32 %v510_v40, %v1076_v15 }
 0x5bc   : > { %v511_v41 = vadd.f32 %v509_v39, %v473_v9  ;;  %515 = vst.msk [vmem:[%s1062_s5] sm:$0xff] %vm514_vm6, %v512_v42 }
 0x5be   : > { %v513_v43 = vsub.f32 %v511_v41, %v1076_v15 }
 0x5c0   : > { %516 = vst.msk [vmem:[%s1067_s8] sm:$0xff] %vm514_vm6, %v513_v43 }
 0x5c1 PF: > { %s16_s12 = sadd.s32 1, %s933_s12  }
 0x5c2   : > { %p13_p5 = scmp.ge.s32.totalorder %s16_s12, 4  }
 0x5c4   :  { %15 = sbr.rel (!%p13_p5) target bundleno = 2 (0x2), region = 116 }
 0x5c9   :  { %550 = vsyncpa [#allocation3], 1 }
 0x5ca   :  { %552 = vsyncpa [#allocation3 + $0x1], 1 }
 0x5cb   :  { %553 = vsyncpa [#allocation5], 1 }

</bundles_post_ra>
